<compile_context>
chip_gen: v7x
topology: tpu7x:2x2x1
jax: 0.10.0
libtpu: 0.0.40
codegen_flags: <defaults>
</compile_context>

<pallas_src>
import jax
import jax.numpy as jnp
from jax.experimental import pallas as pl
from jax.experimental.pallas import tpu as pltpu


def _make_conv1x1_kernel(c_in, c_out, use_mxu):
    if use_mxu:
        def kernel(x_ref, w_ref, b_ref, o_ref):
            # x_ref: (1, C_in, T)   w_ref: (C_out, C_in)   b_ref: (C_out, 1) f32
            acc = jnp.dot(w_ref[...], x_ref[0],
                          preferred_element_type=jnp.float32)
            o_ref[0] = (acc + b_ref[...]).astype(o_ref.dtype)
    else:
        def kernel(x_ref, w_ref, b_ref, o_ref):
            # Tiny-channel path: unrolled VPU FMA (one outer product per input
            # channel).  Keeps the work on the VALU; MXU fill/drain dominates
            # a K=4 matmul anyway.
            t = x_ref.shape[-1]
            w = w_ref[...].astype(jnp.float32)            # (C_out, C_in)
            acc = jnp.zeros((c_out, t), jnp.float32)
            for c in range(c_in):                         # static unroll, C_in tiny
                acc = acc + w[:, c:c + 1] * x_ref[0, c:c + 1, :].astype(jnp.float32)
            o_ref[0] = (acc + b_ref[...]).astype(o_ref.dtype)
    return kernel


def _pick_tile_nk(nk, c_in, c_out, itemsize, requested, vmem_cap=40 << 20):
    """Largest lane tile that is a multiple of 128 (or the full axis) and keeps
    double-buffered x/out tiles + resident weight under vmem_cap."""
    def need(t):
        return (2 * c_in * t + 2 * c_out * t + c_in * c_out) * itemsize + c_out * 4

    t = min(requested, nk)
    if t < nk:
        t = max((t // 128) * 128, min(128, nk))
    while need(t) > vmem_cap and t > 128:
        t = max(((t // 2) // 128) * 128, 128)
    return t, need(t)


def conv1x1_forward(x, weight, bias, *, tile_nk=2048):
    """x: [B, C_in, N, K], weight: [C_out, C_in], bias: [C_out] -> [B, C_out, N, K]."""
    B, c_in, N, K = x.shape
    c_out = weight.shape[0]
    nk = N * K

    # Free reshapes only -- no NCHW<->NHWC transposes (no extra HBM round trips).
    x3 = x.reshape(B, c_in, nk)
    b2 = bias.astype(jnp.float32).reshape(c_out, 1)      # f32 once, in the wrapper

    itemsize = jnp.dtype(x.dtype).itemsize
    t_nk, vmem_need = _pick_tile_nk(nk, c_in, c_out, itemsize, tile_nk)
    grid = (B, pl.cdiv(nk, t_nk))                        # partial last tile OK
    vmem_limit = int(min(48 << 20, max(vmem_need + (8 << 20), 16 << 20)))

    kernel = _make_conv1x1_kernel(c_in, c_out, use_mxu=(c_in >= 16))

    out3 = pl.pallas_call(
        kernel,
        out_shape=jax.ShapeDtypeStruct((B, c_out, nk), x.dtype),
        grid_spec=pltpu.PrefetchScalarGridSpec(
            num_scalar_prefetch=0,
            grid=grid,
            in_specs=[
                pl.BlockSpec((1, c_in, t_nk), lambda b, j: (b, 0, j)),   # x tile (streams)
                pl.BlockSpec((c_out, c_in), lambda b, j: (0, 0)),        # weight, resident
                pl.BlockSpec((c_out, 1), lambda b, j: (0, 0)),           # bias (f32), resident
            ],
            out_specs=pl.BlockSpec((1, c_out, t_nk), lambda b, j: (b, 0, j)),
        ),
        compiler_params=pltpu.CompilerParams(
            dimension_semantics=("parallel", "parallel"),   # independent axes -> megacore
            vmem_limit_bytes=vmem_limit,
        ),
    )(x3, weight, b2)

    return out3.reshape(B, c_out, N, K)


if __name__ == "__main__":
    B, C_IN, C_OUT, N, K = 2, 4, 8, 16, 16

    key = jax.random.PRNGKey(0)
    kx, kw, kb = jax.random.split(key, 3)

    x = jax.random.normal(kx, (B, C_IN, N, K), dtype=jnp.float32)
    # Deterministic synthetic parameters of the right shapes.
    weight = jax.random.normal(kw, (C_OUT, C_IN), dtype=jnp.float32) * 0.1
    bias = jax.random.normal(kb, (C_OUT,), dtype=jnp.float32) * 0.1

    out = jax.block_until_ready(conv1x1_forward(x, weight, bias))

    # Pure-JAX reference of the PyTorch semantics (1x1 conv + bias, bn/act disabled):
    ref = jnp.einsum("bcnk,oc->bonk", x, weight) + bias[None, :, None, None]

    assert out.shape == (B, C_OUT, N, K)
    assert jnp.allclose(out, ref, atol=1e-5, rtol=1e-5)
    print("KERNEL_OK")
</pallas_src>

<mosaic_0001>
module attributes {stable_mosaic.version = 11 : i64} {
  func.func @kernel(%arg0: i32, %arg1: i32, %arg2: memref<1x4x256xf32, #tpu.memory_space<vmem>>, %arg3: memref<8x4xf32, #tpu.memory_space<vmem>>, %arg4: memref<8x1xf32, #tpu.memory_space<vmem>>, %arg5: memref<1x8x256xf32, #tpu.memory_space<vmem>>) attributes {dimension_semantics = [#tpu.dimension_semantics<parallel>, #tpu.dimension_semantics<parallel>], iteration_bounds = array<i64: 2, 1>, scalar_prefetch = 0 : i64, scratch_operands = 0 : i64, tpu.core_type = #tpu.core_type<tc>, window_params = [{transform_indices = @transform_0, window_bounds = array<i64: 1, 4, 256>}, {pipeline_mode = #tpu.pipeline_mode<synchronous>, transform_indices = @transform_1, window_bounds = array<i64: 8, 4>}, {pipeline_mode = #tpu.pipeline_mode<synchronous>, transform_indices = @transform_2, window_bounds = array<i64: 8, 1>}, {transform_indices = @transform_3, window_bounds = array<i64: 1, 8, 256>}]} {
    %c0 = arith.constant 0 : index
    %c0_0 = arith.constant 0 : index
    %0 = vector.load %arg3[%c0, %c0_0] : memref<8x4xf32, #tpu.memory_space<vmem>>, vector<8x4xf32>
    %cst = arith.constant 0.000000e+00 : f32
    %1 = vector.broadcast %cst : f32 to vector<8x256xf32>
    %2 = vector.extract_strided_slice %0 {offsets = [0, 0], sizes = [8, 1], strides = [1, 1]} : vector<8x4xf32> to vector<8x1xf32>
    %c0_1 = arith.constant 0 : index
    %c0_2 = arith.constant 0 : index
    %c0_3 = arith.constant 0 : index
    %3 = vector.load %arg2[%c0_1, %c0_2, %c0_3] : memref<1x4x256xf32, #tpu.memory_space<vmem>>, vector<1x1x256xf32>
    %4 = vector.shape_cast %3 : vector<1x1x256xf32> to vector<1x256xf32>
    %5 = vector.broadcast %2 : vector<8x1xf32> to vector<8x256xf32>
    %6 = vector.broadcast %4 : vector<1x256xf32> to vector<8x256xf32>
    %7 = arith.mulf %5, %6 : vector<8x256xf32>
    %8 = arith.addf %1, %7 : vector<8x256xf32>
    %9 = vector.extract_strided_slice %0 {offsets = [0, 1], sizes = [8, 1], strides = [1, 1]} : vector<8x4xf32> to vector<8x1xf32>
    %c0_4 = arith.constant 0 : index
    %c1 = arith.constant 1 : index
    %c0_5 = arith.constant 0 : index
    %10 = vector.load %arg2[%c0_4, %c1, %c0_5] : memref<1x4x256xf32, #tpu.memory_space<vmem>>, vector<1x1x256xf32>
    %11 = vector.shape_cast %10 : vector<1x1x256xf32> to vector<1x256xf32>
    %12 = vector.broadcast %9 : vector<8x1xf32> to vector<8x256xf32>
    %13 = vector.broadcast %11 : vector<1x256xf32> to vector<8x256xf32>
    %14 = arith.mulf %12, %13 : vector<8x256xf32>
    %15 = arith.addf %8, %14 : vector<8x256xf32>
    %16 = vector.extract_strided_slice %0 {offsets = [0, 2], sizes = [8, 1], strides = [1, 1]} : vector<8x4xf32> to vector<8x1xf32>
    %c0_6 = arith.constant 0 : index
    %c2 = arith.constant 2 : index
    %c0_7 = arith.constant 0 : index
    %17 = vector.load %arg2[%c0_6, %c2, %c0_7] : memref<1x4x256xf32, #tpu.memory_space<vmem>>, vector<1x1x256xf32>
    %18 = vector.shape_cast %17 : vector<1x1x256xf32> to vector<1x256xf32>
    %19 = vector.broadcast %16 : vector<8x1xf32> to vector<8x256xf32>
    %20 = vector.broadcast %18 : vector<1x256xf32> to vector<8x256xf32>
    %21 = arith.mulf %19, %20 : vector<8x256xf32>
    %22 = arith.addf %15, %21 : vector<8x256xf32>
    %23 = vector.extract_strided_slice %0 {offsets = [0, 3], sizes = [8, 1], strides = [1, 1]} : vector<8x4xf32> to vector<8x1xf32>
    %c0_8 = arith.constant 0 : index
    %c3 = arith.constant 3 : index
    %c0_9 = arith.constant 0 : index
    %24 = vector.load %arg2[%c0_8, %c3, %c0_9] : memref<1x4x256xf32, #tpu.memory_space<vmem>>, vector<1x1x256xf32>
    %25 = vector.shape_cast %24 : vector<1x1x256xf32> to vector<1x256xf32>
    %26 = vector.broadcast %23 : vector<8x1xf32> to vector<8x256xf32>
    %27 = vector.broadcast %25 : vector<1x256xf32> to vector<8x256xf32>
    %28 = arith.mulf %26, %27 : vector<8x256xf32>
    %29 = arith.addf %22, %28 : vector<8x256xf32>
    %c0_10 = arith.constant 0 : index
    %c0_11 = arith.constant 0 : index
    %30 = vector.load %arg4[%c0_10, %c0_11] : memref<8x1xf32, #tpu.memory_space<vmem>>, vector<8x1xf32>
    %31 = vector.broadcast %30 : vector<8x1xf32> to vector<8x256xf32>
    %32 = arith.addf %29, %31 : vector<8x256xf32>
    %c0_12 = arith.constant 0 : index
    %c0_13 = arith.constant 0 : index
    %c0_14 = arith.constant 0 : index
    %33 = vector.load %arg5[%c0_12, %c0_13, %c0_14] : memref<1x8x256xf32, #tpu.memory_space<vmem>>, vector<1x8x256xf32>
    %34 = vector.shape_cast %33 : vector<1x8x256xf32> to vector<8x256xf32>
    %35 = vector.shape_cast %32 : vector<8x256xf32> to vector<1x8x256xf32>
    tpu.vector_store %arg5[%c0_12, %c0_13, %c0_14], %35 {strides = array<i32>} : memref<1x8x256xf32, #tpu.memory_space<vmem>>, vector<1x8x256xf32>,
    return
  }
  func.func @transform_0(%arg0: i32, %arg1: i32) -> (i32, i32, i32) {
    %c0_i32 = arith.constant 0 : i32
    %c0_i32_0 = arith.constant 0 : i32
    return %arg0, %c0_i32, %arg1 : i32, i32, i32
  }
  func.func @transform_1(%arg0: i32, %arg1: i32) -> (i32, i32) {
    %c0_i32 = arith.constant 0 : i32
    %c0_i32_0 = arith.constant 0 : i32
    %c0_i32_1 = arith.constant 0 : i32
    return %c0_i32, %c0_i32_0 : i32, i32
  }
  func.func @transform_2(%arg0: i32, %arg1: i32) -> (i32, i32) {
    %c0_i32 = arith.constant 0 : i32
    %c0_i32_0 = arith.constant 0 : i32
    %c0_i32_1 = arith.constant 0 : i32
    return %c0_i32, %c0_i32_0 : i32, i32
  }
  func.func @transform_3(%arg0: i32, %arg1: i32) -> (i32, i32, i32) {
    %c0_i32 = arith.constant 0 : i32
    %c0_i32_0 = arith.constant 0 : i32
    return %arg0, %c0_i32, %arg1 : i32, i32, i32
  }
}

</mosaic_0001>

<bundles_post_ra>
// kernel: tpu_custom_call.1
= control target key start
LH: loop header
LB: loop body
LE: loop exit
PB: predicated region body
PF: predicated region fallthrough
CT: control target
= control target key end

     0   :  { %8 = vsyncpa [#allocation3], 0  ;;  %s698_s0 = inlined_call_operand.vmem [shape: f32[2,4,256], index: 0, kind: input, shape index: {}]   ;;  %s699_s1 = inlined_call_operand.vmem [shape: f32[8,4], index: 1, kind: input, shape index: {}]   ;;  %s700_s2 = inlined_call_operand.vmem [shape: f32[8,1], index: 2, kind: input, shape index: {}]   ;;  %s701_s3 = inlined_call_operand.hbm [shape: f32[2,8,256], index: 3, kind: output, shape index: {}]  }
   0x1   :  { %10 = vsyncpa [#allocation3 + $0x1], 0  ;;  %s576_s12 = smov 0   ;;  %s578_s13 = smov 0  }
   0x2   :  { %s580_s14 = smov 0   ;;  %s582_s15 = smov 0  }
   0x3   :  { %s584_s16 = smov 0   ;;  %s586_s17 = smov 0  }
   0x4 LB: > { %s388_s18 = sadd.s32 4294967295, %s549_s17   ;;  %s389_s19 = sadd.s32 4294967294, %s549_s17   ;;  %s549_s17 = sphi %s586_s17, %s16_s17   ;;  %s545_s16 = sphi %s584_s16, %s708_s16   ;;  %s541_s15 = sphi %s582_s15, %s707_s15   ;;  %s537_s14 = sphi %s580_s14, %s706_s14   ;;  %s533_s13 = sphi %s578_s13, %s705_s13   ;;  %s529_s12 = sphi %s576_s12, %s704_s12  }
   0x5   : > { %s28_s20 = sadd.s32 1, %s545_s16  ;;  %s107_s21 = sadd.s32 1, %s537_s14 }
   0x6   : > { %p30_p0 = scmp.ge.s32.totalorder %s28_s20, 2  ;;  %p117_p1 = scmp.ne.s32.totalorder %s537_s14, %s533_s13 }
   0x7   : > { %p118_p2 = scmp.eq.s32.totalorder %s388_s18, 1  ;;  %p123_p3 = scmp.ne.s32.totalorder %s533_s13, %s529_s12 }
   0x8   : > { %s710_s20 = smov (%p30_p0, %s28_s20), 0  ;;  %p124_p5 = scmp.eq.s32.totalorder %s389_s19, 1 }
   0x9   : > { %p616_p4 = por %p118_p2, %p117_p1  ;;  %s102_s23 = ssub.s32 %s545_s16, %s710_s20 }
   0xa   : > { %p392_p6 = scmp.ge.s32.totalorder %s549_s17, 1  ;;  %p105_p7 = scmp.eq.s32.totalorder %s102_s23, 0 }
   0xb   : > { %p623_p8 = por %p124_p5, %p123_p3  ;;  %p161_p9 = scmp.lt.s32.totalorder %s549_s17, 3 }
   0xc   : > { %s629_s25 = scalar_select %p105_p7, %s537_s14, %s107_s21  }
   0xd   : > { %p162_p10 = pnand %p392_p6, %p161_p9 }
   0xe   : > { %v200_v0 = vld [vmem:[%s699_s1] sm:$0xff] (!%p162_p10)  ;;  %v551_v1 = vmov (!%p162_p10), 0   ;;  %v552_v2 = vmov (!%p162_p10), 2   ;;  %v553_v3 = vmov (!%p162_p10), 1   ;;  %v554_v4 = vmov (!%p162_p10), 3   ;;  %p190_p11 = scmp.lt.s32.totalorder (!%p162_p10), %s541_s15, 1 }
   0xf   : > { %165 = sbr.rel (%p162_p10) target bundleno = 173 (0xad), region = 32  ;;  %465 = vset.pattern.permute.xlu0 (!%p162_p10), %v551_v1  ;;  %467 = vset.pattern.permute.xlu1 (!%p162_p10), %v552_v2  ;;  %v285_v5 = vld [vmem:[%s700_s2] sm:$0xff] (!%p162_p10)  ;;  %v208_v6 = vlaneseq (!%p162_p10)  ;;  %s186_s8 = sand.u32 (!%p162_p10), 1, %s533_s13  }
  0x10   : > { %204 = vperm.xlu0 (!%p162_p10), %465, %v200_v0   ;;  %246 = vperm.xlu1 (!%p162_p10), %467, %v200_v0   ;;  %s393_s9 = sshll.u32 (!%p162_p10), %s186_s8, 4  ;;  %s405_s10 = sshll.u32 (!%p162_p10), %s541_s15, 8 }
  0x11   : > { %v209_v7 = vshrl.u32 (!%p162_p10), %v208_v6, 7  ;;  %s188_s11 = scalar_lea.vmem (!%p162_p10), [#allocation2], %s393_s9  ;;  %s649_s23 = scalar_lea.hbm (!%p162_p10), %s701_s3, %s405_s10 }
  0x12   : > { %s312_s18 = sshll.u32 (!%p162_p10), %s188_s11, 4  ;;  %s555_s27 = smov (!%p162_p10), [#allocation2]   ;;  %s651_s18 = int_to_ptr.vmem [resolvable:$true] %s312_s18 }
  0x13   : > { %v210_v8 = vsub.s32 (!%p162_p10), 0, %v209_v7  ;;  %v214_v9 = vsub.s32 (!%p162_p10), 1, %v209_v7  ;;  %s471_s26 = scalar_lea.vmem (!%p162_p10), %s651_s18, 256  ;;  %s475_s28 = sshll.u32 (!%p162_p10), %s555_s27, 4  ;;  %s476_s28 = int_to_ptr.vmem [resolvable:$false] %s475_s28 }
  0x14   : > { %466 = vset.pattern.permute.xlu0 (!%p162_p10), %v553_v3  ;;  %468 = vset.pattern.permute.xlu1 (!%p162_p10), %v554_v4  ;;  %p472_p12 = scmp.ne.s32.totalorder (!%p162_p10), %s651_s18, %s471_s26  ;;  %s477_s29 = scalar_lea.vmem (!%p162_p10), %s476_s28, 512 }
  0x15   : > { %225 = vperm.xlu0 (!%p162_p10), %466, %v200_v0   ;;  %267 = vperm.xlu1 (!%p162_p10), %468, %v200_v0   ;;  %p478_p1 = scmp.lt.s32.totalorder (!%p162_p10), %s651_s18, %s476_s28  ;;  %p479_p2 = scmp.lt.s32.totalorder (!%p162_p10), %s477_s29, %s471_s26 }
  0x16   : > { %s191_s30 = scalar_select %p190_p11, %s541_s15, 1 }
  0x17   : > { %s296_s15 = scalar_lea.sflag [#allocation3], %s186_s8  ;;  %p473_p13 = pnand %p472_p12, %p616_p4 }
  0x18   : > { %s404_s4 = sshll.u32 %s191_s30, 3  ;;  %p480_p3 = por %p479_p2, %p478_p1 }
  0x19   : > { %469 = vset.pattern.permute.xlu1 %v551_v1  ;;  %470 = vset.pattern.permute.xlu0 %v551_v1  ;;  %s197_s7 = scalar_lea.vmem %s698_s0, %s404_s4  ;;  %p474_p0 = pneg %p473_p13 }
  0x1a   : > { %288 = vperm.xlu1 %469, %v285_v5   ;;  %v201_v10 = vld [vmem:[%s197_s7] ss:$4 sm:$0x3]  ;;  %v396_v11 = vld [vmem:[%s197_s7 + $0x1] ss:$4 sm:$0x3] }
  0x1b   : > { %v397_v14 = vld [vmem:[%s197_s7 + $0x2] ss:$4 sm:$0x3]  ;;  %v398_v15 = vld [vmem:[%s197_s7 + $0x3] ss:$4 sm:$0x3]  ;;  %v211_v16 = vrot.slane %v201_v10, %v210_v8  ;;  %v215_v17 = vrot.slane %v201_v10, %v214_v9  ;;  %v232_v18 = vrot.slane %v396_v11, %v210_v8  ;;  %v236_v19 = vrot.slane %v396_v11, %v214_v9  ;;  %p481_p5 = pnand %p480_p3, %p474_p0 }
  0x1c   : > { %v253_v20 = vrot.slane %v397_v14, %v210_v8  ;;  %v257_v21 = vrot.slane %v397_v14, %v214_v9  ;;  %v274_v22 = vrot.slane %v398_v15, %v210_v8  ;;  %v278_v23 = vrot.slane %v398_v15, %v214_v9 }
  0x8f   : > { %v205_v12 = vpop.permute.xlu0 %204  ;;  %v247_v13 = vpop.permute.xlu1 %246 }
  0x90   : > { %v218_v26 = vmul.f32 %v211_v16, %v205_v12  ;;  %v219_v27 = vmul.f32 %v215_v17, %v205_v12  ;;  %v260_v30 = vmul.f32 %v253_v20, %v247_v13  ;;  %v261_v31 = vmul.f32 %v257_v21, %v247_v13 }
  0x94   : > { %v226_v24 = vpop.permute.xlu0 %225  ;;  %v268_v25 = vpop.permute.xlu1 %267 }
  0x95   : > { %v239_v28 = vmul.f32 %v232_v18, %v226_v24  ;;  %v240_v29 = vmul.f32 %v236_v19, %v226_v24  ;;  %v281_v34 = vmul.f32 %v274_v22, %v268_v25  ;;  %v282_v35 = vmul.f32 %v278_v23, %v268_v25 }
  0x97   : > { %v241_v32 = vadd.f32 %v239_v28, %v218_v26  ;;  %v242_v33 = vadd.f32 %v240_v29, %v219_v27 }
  0x99   : > { %v262_v36 = vadd.f32 %v260_v30, %v241_v32  ;;  %v263_v37 = vadd.f32 %v261_v31, %v242_v33  ;;  %v289_v38 = vpop.permute.xlu1 %288 }
  0x9b   : > { %v283_v39 = vadd.f32 %v281_v34, %v262_v36  ;;  %v284_v40 = vadd.f32 %v282_v35, %v263_v37 }
  0x9d   : > { %v291_v41 = vadd.f32 %v289_v38, %v283_v39  ;;  %v292_v42 = vadd.f32 %v289_v38, %v284_v40 }
  0x9f   : > { %293 = vst [vmem:[%s188_s11] sm:$0xff] %v291_v41  ;;  %294 = vst [vmem:[%s188_s11 + $0x8] sm:$0xff] %v292_v42 }
  0xa0   : > { %484 = shalt.err (!%p481_p5)
}
  0xa1   : > { %s485_s30 = scalar_lea.hbm %s649_s23, 256  ;;  %s489_s6 = scalar_lea.hbm %s701_s3, 512 }
  0xa2   : > { %p486_p6 = scmp.ne.s32.totalorder %s649_s23, %s485_s30  ;;  %p490_p10 = scmp.lt.u32.totalorder %s649_s23, %s701_s3 }
  0xa3   : > { %p491_p11 = scmp.lt.u32.totalorder %s489_s6, %s485_s30  ;;  %p493_p13 = scmp.lt.u32.totalorder %s485_s30, %s649_s23 }
  0xa4   : > { %p487_p7 = pnand %p486_p6, %p616_p4 }
  0xa5   : > { %p492_p12 = por %p491_p11, %p490_p10 }
  0xa6   : > { %p488_p9 = pneg %p487_p7 }
  0xa7   : > { %p494_p0 = por %p493_p13, %p492_p12 }
  0xa9   : > { %p495_p1 = pnand %p494_p0, %p488_p9 }
  0xab   : > { %498 = shalt.err (!%p495_p1)
}
  0xac   : > { %406 = dma.vmem_to_hbm [thread:$0]  (%p616_p4), %s651_s18, 256, %s649_s23, %s296_s15  }
  0xad PF: > { %p412_p2 = scmp.ge.s32.totalorder %s549_s17, 2  ;;  %s324_s9 = sand.u32 1, %s529_s12  }
  0xae   : > { %s325_s10 = scalar_lea.sflag [#allocation3], %s324_s9 }
  0xaf   : > { %p409_p3 = pnand %p412_p2, %p623_p8 }
  0xb1   : > { %524 = dma.done.wait (!%p409_p3), %s325_s10, 256  }
  0xb2   : > { %526 = vsyncadd (!%p409_p3), %s325_s10, 4294967040  ;;  %s16_s17 = sadd.s32 1, %s549_s17   ;;  %s704_s12 = smov %s533_s13 }
  0xb3   : > { %p13_p5 = scmp.ge.s32.totalorder %s16_s17, 4   ;;  %s705_s13 = smov %s537_s14 }
  0xb4   : > { %s706_s14 = smov %s629_s25  ;;  %s707_s15 = smov %s545_s16 }
  0xb5   : > { %s708_s16 = smov %s710_s20  ;;  %15 = sbr.rel (!%p13_p5) target bundleno = 4 (0x4), region = 70 }
  0xbc   :  { %330 = vsyncpa [#allocation3], 1 }
  0xbd   :  { %332 = vsyncpa [#allocation3 + $0x1], 1 }

</bundles_post_ra>
